<compile_context>
chip_gen: v7x
topology: tpu7x:2x2x1
jax: 0.10.0
libtpu: 0.0.40
codegen_flags: <defaults>
</compile_context>

<pallas_src>
import functools

import jax
import jax.numpy as jnp
from jax.experimental import pallas as pl
from jax.experimental.pallas import tpu as pltpu


def _round_up(x, m):
    return ((x + m - 1) // m) * m


def _apply_act(y, act):
    if act == "relu":
        return jnp.maximum(y, 0.0)
    if act == "sigmoid":
        return jax.nn.sigmoid(y)
    if act == "tanh":
        return jnp.tanh(y)
    if act == "exp":
        return jnp.exp(y)
    if act == "affine":
        return y
    raise NotImplementedError(act)


# ----------------------------------------------------------------------------
# Pallas kernel: the entire MLP for one batch tile.
# refs = (x_ref, w0_ref, b0_ref, w1_ref, b1_ref, ..., o_ref)
#   x_ref : (TB, F0p)      wi_ref : (Fip, F{i+1}p)    bi_ref : (1, F{i+1}p)
#   o_ref : (TB, FLp)      intermediate activations never touch HBM.
# ----------------------------------------------------------------------------
def _fused_mlp_kernel(*refs, acts):
    n_layers = len(acts)
    x_ref = refs[0]
    o_ref = refs[-1]
    h = x_ref[...].astype(jnp.float32)
    for i in range(n_layers):
        w = refs[1 + 2 * i][...]
        b = refs[2 + 2 * i][...].astype(jnp.float32)
        # MXU matmul with f32 accumulation; bias + activation stay f32 on VPU/EUP.
        y = jnp.dot(h.astype(w.dtype), w, preferred_element_type=jnp.float32) + b
        h = _apply_act(y, acts[i])
    o_ref[...] = h.astype(o_ref.dtype)


def _build_fused_mlp_call(Bp, TB, dims_p, acts):
    """Construct the pallas_call once for a given padded batch / batch tile."""
    n_layers = len(acts)
    nb = Bp // TB

    in_specs = [pl.BlockSpec((TB, dims_p[0]), lambda i: (i, 0))]
    for li in range(n_layers):
        fin_p, fout_p = dims_p[li], dims_p[li + 1]
        # Same block for every batch tile -> weights/biases stay VMEM-resident.
        in_specs += [
            pl.BlockSpec((fin_p, fout_p), lambda i: (0, 0)),
            pl.BlockSpec((1, fout_p), lambda i: (0, 0)),
        ]

    # TODO(synk): set vmem_limit_bytes per-generation (<=~56 MiB on v7x, ~100 MiB on
    # v5e/v6e) once hidden dims grow large enough that resident weights exceed the
    # 16/32 MiB scoped default.
    return pl.pallas_call(
        functools.partial(_fused_mlp_kernel, acts=tuple(acts)),
        out_shape=jax.ShapeDtypeStruct((Bp, dims_p[-1]), jnp.float32),
        grid=(nb,),
        in_specs=in_specs,
        out_specs=pl.BlockSpec((TB, dims_p[-1]), lambda i: (i, 0)),
        compiler_params=pltpu.CompilerParams(
            dimension_semantics=("parallel",),  # batch tiles are independent
        ),
    )


# ----------------------------------------------------------------------------
# torch_NN equivalent
# ----------------------------------------------------------------------------
class PallasNN:
    """Mirror of torch_NN: fc0 -> relu0 -> fc1 -> relu1 -> ... -> fc{L-1} -> final_act."""

    def __init__(self, inp=1, out=1, hidden=(), final_act="affine", key=None,
                 batch_tile=128, weight_dtype=jnp.float32):
        self.inp = inp
        self.out = out
        self.hidden = list(hidden)
        self.num_layers = len(self.hidden) + 1
        self.final_act = final_act
        self.batch_tile = int(batch_tile)
        if self.num_layers > 10:
            raise NotImplementedError
        if key is None:
            key = jax.random.PRNGKey(0)

        # Deterministic init mimicking nn.Linear's U(-1/sqrt(fan_in), 1/sqrt(fan_in)).
        self.weights_t = []  # exact (in, out) weights for reference / copy_weights-style use
        self.biases = []
        for i in range(self.num_layers):
            fan_in = self.inp if i == 0 else self.hidden[i - 1]
            fan_out = self.out if i + 1 == self.num_layers else self.hidden[i]
            key, kw, kb = jax.random.split(key, 3)
            bound = 1.0 / jnp.sqrt(jnp.asarray(fan_in, jnp.float32))
            w = jax.random.uniform(kw, (fan_out, fan_in), jnp.float32, -bound, bound)
            b = jax.random.uniform(kb, (fan_out,), jnp.float32, -bound, bound)
            self.weights_t.append(w.T)  # (in, out)
            self.biases.append(b)

        # Per-layer activation: ReLU between layers, final_act at the end.
        self.acts = ["relu"] * (self.num_layers - 1) + [self.final_act]

        # Minimal padding: sublane (8) alignment on all feature widths, lane-dense
        # (128) only on the final output (unmasked stores). Padded lanes carry exact
        # zeros through the ReLU layers (zero weight rows/cols + zero bias) and are
        # sliced off inside the jitted forward, so nonlinear final activations on
        # padded lanes never leak.
        dims = [self.inp] + self.hidden + [self.out]
        self.dims_p = [_round_up(d, 8) for d in dims[:-1]] + [_round_up(dims[-1], 128)]

        self._flat_params = []  # [w0, b0, w1, b1, ...] padded
        for i in range(self.num_layers):
            fin, fout = self.weights_t[i].shape
            fin_p, fout_p = self.dims_p[i], self.dims_p[i + 1]
            w_p = (jnp.zeros((fin_p, fout_p), jnp.float32)
                   .at[:fin, :fout].set(self.weights_t[i])
                   .astype(weight_dtype))
            b_p = jnp.zeros((1, fout_p), jnp.float32).at[0, :fout].set(self.biases[i])
            self._flat_params += [w_p, b_p]

        # pallas_call cache keyed on (padded batch, batch tile) + single jit over the
        # whole pad -> kernel -> slice path.
        self._call_cache = {}
        self._forward_jit = jax.jit(self._forward_impl)

    # ---- internals ---------------------------------------------------------
    def _get_call(self, Bp, TB):
        key = (Bp, TB)
        if key not in self._call_cache:
            self._call_cache[key] = _build_fused_mlp_call(Bp, TB, self.dims_p, self.acts)
        return self._call_cache[key]

    def _forward_impl(self, x):
        B, Fin = x.shape
        assert Fin == self.inp
        TB = min(self.batch_tile, _round_up(B, 8))
        Bp = _round_up(B, TB)
        x_p = jnp.zeros((Bp, self.dims_p[0]), jnp.float32).at[:B, :Fin].set(x)
        out_p = self._get_call(Bp, TB)(x_p, *self._flat_params)
        # Slice is fused into the same jit program (no extra dispatch / HBM round trip).
        return out_p[:B, :self.out]

    # ---- public API --------------------------------------------------------
    def forward(self, x):
        return self._forward_jit(x)

    __call__ = forward


if __name__ == "__main__":
    # Shapes consistent with the module's forward: batch=8 (like dummy_inp), inp=4,
    # hidden=[32, 32], out=8, final_act='affine' (default).
    key = jax.random.PRNGKey(0)
    key, kx, kp = jax.random.split(key, 3)
    batch, inp, hidden, out = 8, 4, [32, 32], 8

    net = PallasNN(inp=inp, out=out, hidden=hidden, final_act="affine", key=kp)
    x = jax.random.normal(kx, (batch, inp), jnp.float32)

    y = net(x)
    jax.block_until_ready(y)
    y2 = net(x)  # second call: hits the cached compiled program
    jax.block_until_ready(y2)

    # Pure-JAX reference of the same math (using the unpadded parameters).
    ref = x
    for i in range(net.num_layers):
        ref = ref @ net.weights_t[i] + net.biases[i]
        if i + 1 < net.num_layers:
            ref = jnp.maximum(ref, 0.0)
    assert y.shape == (batch, out)
    assert jnp.allclose(y, ref, atol=1e-5, rtol=1e-5)
    assert jnp.allclose(y2, ref, atol=1e-5, rtol=1e-5)

    print("KERNEL_OK")
</pallas_src>

<mosaic_0001>
module attributes {stable_mosaic.version = 11 : i64} {
  func.func @_fused_mlp_kernel(%arg0: i32, %arg1: memref<8x8xf32, #tpu.memory_space<vmem>>, %arg2: memref<8x32xf32, #tpu.memory_space<vmem>>, %arg3: memref<1x32xf32, #tpu.memory_space<vmem>>, %arg4: memref<32x32xf32, #tpu.memory_space<vmem>>, %arg5: memref<1x32xf32, #tpu.memory_space<vmem>>, %arg6: memref<32x128xf32, #tpu.memory_space<vmem>>, %arg7: memref<1x128xf32, #tpu.memory_space<vmem>>, %arg8: memref<8x128xf32, #tpu.memory_space<vmem>>) attributes {dimension_semantics = [#tpu.dimension_semantics<parallel>], iteration_bounds = array<i64: 1>, scalar_prefetch = 0 : i64, scratch_operands = 0 : i64, tpu.core_type = #tpu.core_type<tc>, window_params = [{transform_indices = @transform_0, window_bounds = array<i64: 8, 8>}, {pipeline_mode = #tpu.pipeline_mode<synchronous>, transform_indices = @transform_1, window_bounds = array<i64: 8, 32>}, {pipeline_mode = #tpu.pipeline_mode<synchronous>, transform_indices = @transform_2, window_bounds = array<i64: 1, 32>}, {pipeline_mode = #tpu.pipeline_mode<synchronous>, transform_indices = @transform_3, window_bounds = array<i64: 32, 32>}, {pipeline_mode = #tpu.pipeline_mode<synchronous>, transform_indices = @transform_4, window_bounds = array<i64: 1, 32>}, {pipeline_mode = #tpu.pipeline_mode<synchronous>, transform_indices = @transform_5, window_bounds = array<i64: 32, 128>}, {pipeline_mode = #tpu.pipeline_mode<synchronous>, transform_indices = @transform_6, window_bounds = array<i64: 1, 128>}, {transform_indices = @transform_7, window_bounds = array<i64: 8, 128>}]} {
    %c0 = arith.constant 0 : index
    %c0_0 = arith.constant 0 : index
    %0 = vector.load %arg1[%c0, %c0_0] : memref<8x8xf32, #tpu.memory_space<vmem>>, vector<8x8xf32>
    %c0_1 = arith.constant 0 : index
    %c0_2 = arith.constant 0 : index
    %1 = vector.load %arg2[%c0_1, %c0_2] : memref<8x32xf32, #tpu.memory_space<vmem>>, vector<8x32xf32>
    %c0_3 = arith.constant 0 : index
    %c0_4 = arith.constant 0 : index
    %2 = vector.load %arg3[%c0_3, %c0_4] : memref<1x32xf32, #tpu.memory_space<vmem>>, vector<1x32xf32>
    %cst = arith.constant dense<0.000000e+00> : vector<8x32xf32>
    %3 = tpu.matmul %0, %1, %cst {dimension_numbers = #tpu.dot_dimension_numbers<[1], [0], [0], [1], [0, 0, 1, 1], [], []>} : vector<8x8xf32>, vector<8x32xf32>, vector<8x32xf32> -> vector<8x32xf32>
    %4 = vector.broadcast %2 : vector<1x32xf32> to vector<8x32xf32>
    %5 = arith.addf %3, %4 : vector<8x32xf32>
    %cst_5 = arith.constant 0.000000e+00 : f32
    %6 = vector.broadcast %cst_5 : f32 to vector<8x32xf32>
    %7 = arith.maximumf %5, %6 : vector<8x32xf32>
    %c0_6 = arith.constant 0 : index
    %c0_7 = arith.constant 0 : index
    %8 = vector.load %arg4[%c0_6, %c0_7] : memref<32x32xf32, #tpu.memory_space<vmem>>, vector<32x32xf32>
    %c0_8 = arith.constant 0 : index
    %c0_9 = arith.constant 0 : index
    %9 = vector.load %arg5[%c0_8, %c0_9] : memref<1x32xf32, #tpu.memory_space<vmem>>, vector<1x32xf32>
    %cst_10 = arith.constant dense<0.000000e+00> : vector<8x32xf32>
    %10 = tpu.matmul %7, %8, %cst_10 {dimension_numbers = #tpu.dot_dimension_numbers<[1], [0], [0], [1], [0, 0, 1, 1], [], []>} : vector<8x32xf32>, vector<32x32xf32>, vector<8x32xf32> -> vector<8x32xf32>
    %11 = vector.broadcast %9 : vector<1x32xf32> to vector<8x32xf32>
    %12 = arith.addf %10, %11 : vector<8x32xf32>
    %cst_11 = arith.constant 0.000000e+00 : f32
    %13 = vector.broadcast %cst_11 : f32 to vector<8x32xf32>
    %14 = arith.maximumf %12, %13 : vector<8x32xf32>
    %c0_12 = arith.constant 0 : index
    %c0_13 = arith.constant 0 : index
    %15 = vector.load %arg6[%c0_12, %c0_13] : memref<32x128xf32, #tpu.memory_space<vmem>>, vector<32x128xf32>
    %c0_14 = arith.constant 0 : index
    %c0_15 = arith.constant 0 : index
    %16 = vector.load %arg7[%c0_14, %c0_15] : memref<1x128xf32, #tpu.memory_space<vmem>>, vector<1x128xf32>
    %cst_16 = arith.constant dense<0.000000e+00> : vector<8x128xf32>
    %17 = tpu.matmul %14, %15, %cst_16 {dimension_numbers = #tpu.dot_dimension_numbers<[1], [0], [0], [1], [0, 0, 1, 1], [], []>} : vector<8x32xf32>, vector<32x128xf32>, vector<8x128xf32> -> vector<8x128xf32>
    %18 = vector.broadcast %16 : vector<1x128xf32> to vector<8x128xf32>
    %19 = arith.addf %17, %18 : vector<8x128xf32>
    %c0_17 = arith.constant 0 : index
    %c0_18 = arith.constant 0 : index
    %20 = vector.load %arg8[%c0_17, %c0_18] : memref<8x128xf32, #tpu.memory_space<vmem>>, vector<8x128xf32>
    tpu.vector_store %arg8[%c0_17, %c0_18], %19 {strides = array<i32>} : memref<8x128xf32, #tpu.memory_space<vmem>>, vector<8x128xf32>,
    return
  }
  func.func @transform_0(%arg0: i32) -> (i32, i32) {
    %c0_i32 = arith.constant 0 : i32
    %c0_i32_0 = arith.constant 0 : i32
    return %arg0, %c0_i32 : i32, i32
  }
  func.func @transform_1(%arg0: i32) -> (i32, i32) {
    %c0_i32 = arith.constant 0 : i32
    %c0_i32_0 = arith.constant 0 : i32
    %c0_i32_1 = arith.constant 0 : i32
    return %c0_i32, %c0_i32_0 : i32, i32
  }
  func.func @transform_2(%arg0: i32) -> (i32, i32) {
    %c0_i32 = arith.constant 0 : i32
    %c0_i32_0 = arith.constant 0 : i32
    %c0_i32_1 = arith.constant 0 : i32
    return %c0_i32, %c0_i32_0 : i32, i32
  }
  func.func @transform_3(%arg0: i32) -> (i32, i32) {
    %c0_i32 = arith.constant 0 : i32
    %c0_i32_0 = arith.constant 0 : i32
    %c0_i32_1 = arith.constant 0 : i32
    return %c0_i32, %c0_i32_0 : i32, i32
  }
  func.func @transform_4(%arg0: i32) -> (i32, i32) {
    %c0_i32 = arith.constant 0 : i32
    %c0_i32_0 = arith.constant 0 : i32
    %c0_i32_1 = arith.constant 0 : i32
    return %c0_i32, %c0_i32_0 : i32, i32
  }
  func.func @transform_5(%arg0: i32) -> (i32, i32) {
    %c0_i32 = arith.constant 0 : i32
    %c0_i32_0 = arith.constant 0 : i32
    %c0_i32_1 = arith.constant 0 : i32
    return %c0_i32, %c0_i32_0 : i32, i32
  }
  func.func @transform_6(%arg0: i32) -> (i32, i32) {
    %c0_i32 = arith.constant 0 : i32
    %c0_i32_0 = arith.constant 0 : i32
    %c0_i32_1 = arith.constant 0 : i32
    return %c0_i32, %c0_i32_0 : i32, i32
  }
  func.func @transform_7(%arg0: i32) -> (i32, i32) {
    %c0_i32 = arith.constant 0 : i32
    %c0_i32_0 = arith.constant 0 : i32
    return %arg0, %c0_i32 : i32, i32
  }
}

</mosaic_0001>

<bundles_post_ra>
// kernel: _forward_impl.1
= control target key start
LH: loop header
LB: loop body
LE: loop exit
PB: predicated region body
PF: predicated region fallthrough
CT: control target
= control target key end

     0   :  { %12 = vsyncpa [#allocation3], 0  ;;  %s616_s0 = inlined_call_operand.vmem [shape: f32[8,8], index: 0, kind: input, shape index: {}]   ;;  %s617_s1 = inlined_call_operand.hbm [shape: f32[8,32], index: 1, kind: input, shape index: {}]   ;;  %s618_s2 = inlined_call_operand.hbm [shape: f32[1,32], index: 2, kind: input, shape index: {}]   ;;  %s619_s3 = inlined_call_operand.vmem [shape: f32[32,32], index: 3, kind: input, shape index: {}]   ;;  %s620_s4 = inlined_call_operand.hbm [shape: f32[1,32], index: 4, kind: input, shape index: {}]   ;;  %s621_s5 = inlined_call_operand.vmem [shape: f32[32,128], index: 5, kind: input, shape index: {}]   ;;  %s622_s6 = inlined_call_operand.vmem [shape: f32[1,128], index: 6, kind: input, shape index: {}]   ;;  %s623_s7 = inlined_call_operand.hbm [shape: f32[8,128], index: 7, kind: output, shape index: {}]  }
   0x1   :  { %13 = vsyncpa [#allocation6], 0 }
   0x2   :  { %14 = vsyncpa [#allocation4], 0  ;;  %s491_s24 = smov [#allocation5]   ;;  %s492_s26 = smov [#allocation2]  }
   0x3   :  { %s33_s25 = sshll.u32 %s491_s24, 4  ;;  %s23_s27 = sshll.u32 %s492_s26, 4  ;;  %s34_s25 = int_to_ptr.vmem [resolvable:$true] %s33_s25  ;;  %s24_s27 = int_to_ptr.vmem [resolvable:$true] %s23_s27 }
   0x4   :  { %s397_s30 = scalar_lea.hbm %s618_s2, 16 }
   0x5   :  { %p398_p0 = scmp.ne.s32.totalorder %s618_s2, %s397_s30  ;;  %p401_p1 = scmp.lt.u32.totalorder %s397_s30, %s618_s2 }
   0x7   :  { %p403_p2 = pnand %p401_p1, %p398_p0 }
   0x9   :  { %406 = shalt.err (!%p403_p2)
}
   0xa   :  { %s407_s12 = scalar_lea.vmem %s34_s25, 16  ;;  %s411_s13 = scalar_lea.vmem %s34_s25, 32 }
   0xb   :  { %p408_p3 = scmp.ne.s32.totalorder %s34_s25, %s407_s12  ;;  %p412_p4 = scmp.lt.s32.totalorder %s34_s25, %s34_s25 }
   0xc   :  { %p413_p5 = scmp.lt.s32.totalorder %s411_s13, %s407_s12 }
   0xe   :  { %p414_p6 = por %p413_p5, %p412_p4 }
  0x10   :  { %p415_p7 = pnand %p414_p6, %p408_p3 }
  0x12   :  { %418 = shalt.err (!%p415_p7)
}
  0x13   :  { %36 = dma.hbm_to_vmem [thread:$0]  %s618_s2, 16, %s34_s25, [#allocation6]  }
  0x14   :  { %s419_s18 = scalar_lea.hbm %s617_s1, 128 }
  0x15   :  { %p420_p8 = scmp.ne.s32.totalorder %s617_s1, %s419_s18  ;;  %p423_p9 = scmp.lt.u32.totalorder %s419_s18, %s617_s1 }
  0x17   :  { %p425_p10 = pnand %p423_p9, %p420_p8 }
  0x19   :  { %428 = shalt.err (!%p425_p10)
}
  0x1a   :  { %s429_s23 = scalar_lea.vmem %s24_s27, 128  ;;  %p434_p12 = scmp.lt.s32.totalorder %s24_s27, %s24_s27 }
  0x1b   :  { %p430_p11 = scmp.ne.s32.totalorder %s24_s27, %s429_s23  ;;  %p435_p13 = scmp.lt.s32.totalorder %s429_s23, %s429_s23 }
  0x1d   :  { %p436_p0 = por %p435_p13, %p434_p12 }
  0x1f   :  { %p437_p1 = pnand %p436_p0, %p430_p11 }
  0x21   :  { %440 = shalt.err (!%p437_p1)
}
  0x22   :  { %26 = dma.hbm_to_vmem [thread:$0]  %s617_s1, 128, %s24_s27, [#allocation3]  }
  0x23   :  { %s493_s25 = smov [#allocation7]   ;;  %s441_s30 = scalar_lea.hbm %s620_s4, 16 }
  0x24   :  { %s45_s26 = sshll.u32 %s493_s25, 4  ;;  %p442_p2 = scmp.ne.s32.totalorder %s620_s4, %s441_s30  ;;  %s46_s26 = int_to_ptr.vmem [resolvable:$true] %s45_s26 }
  0x25   :  { %p445_p3 = scmp.lt.u32.totalorder %s441_s30, %s620_s4 }
  0x27   :  { %p447_p4 = pnand %p445_p3, %p442_p2 }
  0x29   :  { %450 = shalt.err (!%p447_p4)
}
  0x2a   :  { %s451_s12 = scalar_lea.vmem %s46_s26, 16  ;;  %s455_s1 = scalar_lea.vmem %s46_s26, 32 }
  0x2b   :  { %p452_p5 = scmp.ne.s32.totalorder %s46_s26, %s451_s12  ;;  %p456_p6 = scmp.lt.s32.totalorder %s46_s26, %s46_s26 }
  0x2c   :  { %p457_p7 = scmp.lt.s32.totalorder %s455_s1, %s451_s12 }
  0x2e   :  { %p458_p8 = por %p457_p7, %p456_p6 }
  0x30   :  { %p459_p9 = pnand %p458_p8, %p452_p5 }
  0x32   :  { %462 = shalt.err (!%p459_p9)
}
  0x33   :  { %48 = dma.hbm_to_vmem [thread:$0]  %s620_s4, 16, %s46_s26, [#allocation6]  }
  0x34   :  { %485 = dma.done.wait [#allocation3], 128  }
  0x35   :  { %486 = vsyncadd [#allocation3], 4294967168 }
  0x36   :  { %487 = dma.done.wait [#allocation6], 32  }
  0x37   :  { %488 = vsyncadd [#allocation6], 4294967264  ;;  %v494_v0 = vmov 0.0   ;;  %vm495_vm0 = vmmov 0   ;;  %v496_v1 = vmov 0.0|0.0   ;;  %vm71_vm1 = vcmask 64512  }
  0x38   :  { %351 = vmatprep.subr.mxu0 %v494_v0  ;;  %353 = vmatprep.mubr.msk.f32.mxu0 %vm495_vm0, %v494_v0  ;;  %v63_v2 = vld [vmem:[#allocation2] sm:$0xff]  ;;  %v147_v5 = vld [vmem:[%s619_s3 + $0x8] sm:$0xff]  ;;  %v148_v7 = vld [vmem:[%s619_s3 + $0x10] sm:$0xff]  ;;  %vm157_vm2 = vcmask 261120   ;;  %s497_s8 = smov [#allocation8]  }
  0x39   :  { %378 = vmatprep.subr.bf16.mxu1 %v496_v1  ;;  %364 = vmatprep.mubr.msk.f32.mxu1 %vm495_vm0, %v494_v0  ;;  %v62_v3 = vld [vmem:[%s616_s0] sm:$0xff]  ;;  %v149_v8 = vld [vmem:[%s619_s3 + $0x18] sm:$0xff]  ;;  %v233_v11 = vld [vmem:[%s621_s5 + $0x8] sm:$0xff]  ;;  %s323_s9 = sshll.u32 %s497_s8, 4  ;;  %s324_s9 = int_to_ptr.vmem [resolvable:$true] %s323_s9 }
  0x3a   :  { %v146_v4 = vld [vmem:[%s619_s3] sm:$0xff]  ;;  %352 = vmatpush3.msra.mxu0 %v63_v2  ;;  %v382_v9 = vpack.c.bf16 %v149_v8, %v148_v7  ;;  %v333_v13 = vld [vmem:[#allocation5] ss:$0 sm:$0xff]  ;;  %v234_v18 = vld [vmem:[%s621_s5 + $0x10] sm:$0xff]  ;;  %p468_p11 = scmp.lt.s32.totalorder %s324_s9, %s324_s9 }
  0x3b   :  { %354 = vmatmul.mubr.msk.f32.vlgmr.msra.gmra.mrb[0].mxu0 %vm71_vm1, %v62_v3  ;;  %v379_v6 = vpack.c.bf16 %v147_v5, %v146_v4  ;;  %384 = vmatprep.subr.bf16.mxu0 %v496_v1  ;;  %v232_v10 = vld [vmem:[%s621_s5] sm:$0xff]  ;;  %v235_v19 = vld [vmem:[%s621_s5 + $0x18] sm:$0xff]  ;;  %v335_v21 = vld [vmem:[#allocation7] ss:$0 sm:$0xff]  ;;  %s463_s5 = scalar_lea.vmem %s324_s9, 128 }
  0x3c   :  { %375 = vmatprep.mubr.msk.f32.mxu0 %vm495_vm0, %v494_v0  ;;  %v385_v12 = vpack.c.bf16 %v233_v11, %v232_v10  ;;  %v388_v20 = vpack.c.bf16 %v235_v19, %v234_v18  ;;  %v337_v26 = vld [vmem:[%s622_s6] ss:$0 sm:$0xff]  ;;  %p464_p10 = scmp.ne.s32.totalorder %s324_s9, %s463_s5  ;;  %p469_p12 = scmp.lt.s32.totalorder %s463_s5, %s463_s5 }
  0x3d   :  { %380 = vmatpush3.bf16.msra.mxu1 %v379_v6 }
  0x3e   :  { %381 = vmatprep.subr.bf16.mxu1 %v496_v1  ;;  %386 = vmatpush3.bf16.msra.mxu0 %v385_v12  ;;  %p470_p13 = por %p469_p12, %p468_p11 }
  0x3f   :  { %387 = vmatprep.subr.bf16.mxu0 %v496_v1 }
  0x40   :  { %p471_p0 = pnand %p470_p13, %p464_p10 }
  0x41   :  { %383 = vmatpush3.bf16.msra.mxu1 %v382_v9 }
  0x42   :  { %389 = vmatpush3.bf16.msra.mxu0 %v388_v20 }
 0x10e   :  { %v141_v14 = vpop.f32.mrb[0].mxu0 }
 0x10f   :  { %v142_v15 = vadd.f32 %v333_v13, %v141_v14  ;;  %v355_v16 = vpop.f32.mrb[1].mxu0 }
 0x111   :  { %v145_v17 = vmax.f32 %v142_v15, 0.0 }
 0x113   :  { %365 = vmatmul.mubr.msk.f32.vlgmr.msra.gmra.mrb[0].mxu1 %vm157_vm2, %v145_v17 }
 0x1e6   :  { %v227_v22 = vpop.f32.mrb[0].mxu1 }
 0x1e7   :  { %v228_v23 = vadd.f32 %v335_v21, %v227_v22  ;;  %v366_v24 = vpop.f32.mrb[1].mxu1 }
 0x1e9   :  { %v231_v25 = vmax.f32 %v228_v23, 0.0 }
 0x1eb   :  { %376 = vmatmul.mubr.msk.f32.vlgmr.msra.gmra.mrb[2].mxu0 %vm157_vm2, %v231_v25 }
 0x2be   :  { %v312_v27 = vpop.f32.mrb[2].mxu0 }
 0x2bf   :  { %v313_v28 = vadd.f32 %v337_v26, %v312_v27  ;;  %v377_v29 = vpop.f32.mrb[3].mxu0 }
 0x2c1   :  { %316 = vst [vmem:[#allocation8] sm:$0xff] %v313_v28 }
 0x2c2   :  { %474 = shalt.err (!%p471_p0)
}
 0x2c3   :  { %s475_s12 = scalar_lea.hbm %s623_s7, 128 }
 0x2c4   :  { %p476_p1 = scmp.ne.s32.totalorder %s623_s7, %s475_s12  ;;  %p479_p2 = scmp.lt.u32.totalorder %s475_s12, %s623_s7 }
 0x2c6   :  { %p481_p3 = pnand %p479_p2, %p476_p1 }
 0x2c8   :  { %484 = shalt.err (!%p481_p3)
}
 0x2c9   :  { %326 = dma.vmem_to_hbm [thread:$0]  %s324_s9, 128, %s623_s7, [#allocation4]  }
 0x2ca   :  { %489 = dma.done.wait [#allocation4], 128  }
 0x2cb   :  { %490 = vsyncadd [#allocation4], 4294967168 }
 0x2cc   :  { %330 = vsyncpa [#allocation3], 1 }
 0x2cd   :  { %331 = vsyncpa [#allocation6], 1 }
 0x2ce   :  { %332 = vsyncpa [#allocation4], 1 }

</bundles_post_ra>
